<compile_context>
chip_gen: v5e
topology: v5e:2x2
jax: 0.10.0
libtpu: 0.0.40
codegen_flags: <defaults>
</compile_context>

<pallas_src>
import jax
import jax.numpy as jnp
from jax.experimental import pallas as pl
from jax.experimental.pallas import tpu as pltpu


def _fused_kernel(x_ref, w_ref, b_ref, o_ref):
    """Fused linear(over C) + relu + softmax(over D_out) + tanh.

    x_ref: (1, C, TL)     VMEM   (native PyTorch NCL layout; L on lanes)
    w_ref: (D_out, C)     SMEM   (nn.Linear weight layout, read as scalars)
    b_ref: (D_out,)       SMEM
    o_ref: (1, D_out, TL) VMEM   (native PyTorch output layout)
    """
    _, C, TL = x_ref.shape
    D_out = o_ref.shape[1]

    # Channel rows of the input tile, each a lane-dense (1, TL) vector.
    xs = [x_ref[0, c:c + 1, :] for c in range(C)]

    # Linear + bias + ReLU (dropout is an eval-mode no-op), fully unrolled
    # as VPU broadcast-multiply-adds with SMEM scalar weights.
    rows = []
    for o in range(D_out):
        acc = xs[0] * w_ref[o, 0]
        for c in range(1, C):
            acc = acc + xs[c] * w_ref[o, c]
        rows.append(jnp.maximum(acc + b_ref[o], 0.0))

    # Numerically-stable softmax over the D_out rows (pairwise, stays on
    # lane-dense vregs -> no cross-lane reduction hardware involved).
    m = rows[0]
    for o in range(1, D_out):
        m = jnp.maximum(m, rows[o])
    es = [jnp.exp(r - m) for r in rows]
    denom = es[0]
    for o in range(1, D_out):
        denom = denom + es[o]
    inv = pl.reciprocal(denom, approx=True)  # EUP slot; frees the VALU

    out = jnp.concatenate([jnp.tanh(e * inv) for e in es], axis=0)  # (D_out, TL)
    o_ref[0, :, :] = out.astype(o_ref.dtype)


def _pick_tile_l(L):
    """Largest lane-dense (multiple-of-128) tile dividing L, else whole L.

    Tiles are tiny here (only C + D_out = 4 rows per step), so even 2048
    lanes double-buffered is well under any generation's scoped VMEM limit.
    """
    for t in (512, 1024, 2048, 256, 128):
        if L % t == 0:
            return t
    return L


def model_forward(x1, w1, b1, *, tile_l=None):
    """x1: (B, C, L) float32 (PyTorch NCL layout). Returns (B, D_out, L)."""
    B, C, L = x1.shape
    D_out, D_in = w1.shape
    assert D_in == C, "Linear in_features must match the channel dim"

    if tile_l is None:
        tile_l = _pick_tile_l(L)
    grid = (B, L // tile_l)

    return pl.pallas_call(
        _fused_kernel,
        out_shape=jax.ShapeDtypeStruct((B, D_out, L), x1.dtype),
        grid=grid,
        in_specs=[
            pl.BlockSpec((1, C, tile_l), lambda b, l: (b, 0, l)),
            pl.BlockSpec(memory_space=pltpu.MemorySpace.SMEM),  # weight scalars
            pl.BlockSpec(memory_space=pltpu.MemorySpace.SMEM),  # bias scalars
        ],
        out_specs=pl.BlockSpec((1, D_out, tile_l), lambda b, l: (b, 0, l)),
        compiler_params=pltpu.CompilerParams(
            dimension_semantics=("parallel", "parallel"),
        ),
    )(x1, w1, b1)


def _reference(x1, w1, b1):
    v1 = jnp.transpose(x1, (0, 2, 1))
    y = v1 @ w1.T + b1
    y = jnp.maximum(y, 0.0)
    y = jax.nn.softmax(y, axis=2)
    y = jnp.tanh(y)
    return jnp.transpose(y, (0, 2, 1))


if __name__ == "__main__":
    key = jax.random.PRNGKey(0)
    kx, kw, kb, kx2 = jax.random.split(key, 4)

    # Linear(2, 2): channel dim (after permute, the feature dim) must be 2.
    C, D_out = 2, 2
    bound = 1.0 / (C ** 0.5)
    w1 = jax.random.uniform(kw, (D_out, C), jnp.float32, -bound, bound)
    b1 = jax.random.uniform(kb, (D_out,), jnp.float32, -bound, bound)

    # Lane-dense case exercising the tiled (B, L // TL) grid.
    B, L = 2, 1024
    x_big = jax.random.normal(kx, (B, C, L), dtype=jnp.float32)
    out_big = jax.block_until_ready(model_forward(x_big, w1, b1))
    ref_big = _reference(x_big, w1, b1)
    assert out_big.shape == (B, D_out, L)
    # Tolerance accounts for the approximate (EUP) reciprocal in the softmax.
    assert jnp.allclose(out_big, ref_big, atol=2e-3, rtol=2e-3)

    # Original module shape x1 = (1, 2, 2) (whole-L block fallback path).
    x_small = jax.random.normal(kx2, (1, 2, 2), dtype=jnp.float32)
    out_small = jax.block_until_ready(model_forward(x_small, w1, b1))
    ref_small = _reference(x_small, w1, b1)
    assert out_small.shape == (1, 2, 2)
    assert jnp.allclose(out_small, ref_small, atol=2e-3, rtol=2e-3)

    print("KERNEL_OK")
</pallas_src>

<mosaic_0001>
module attributes {stable_mosaic.version = 11 : i64} {
  func.func @_fused_kernel(%arg0: i32, %arg1: i32, %arg2: memref<1x2x512xf32, #tpu.memory_space<vmem>>, %arg3: memref<2x2xf32, #tpu.memory_space<smem>>, %arg4: memref<2xf32, #tpu.memory_space<smem>>, %arg5: memref<1x2x512xf32, #tpu.memory_space<vmem>>) attributes {dimension_semantics = [#tpu.dimension_semantics<parallel>, #tpu.dimension_semantics<parallel>], iteration_bounds = array<i64: 2, 2>, scalar_prefetch = 0 : i64, scratch_operands = 0 : i64, tpu.core_type = #tpu.core_type<tc>, window_params = [{transform_indices = @transform_0, window_bounds = array<i64: 1, 2, 512>}, {transform_indices = @transform_1, window_bounds = array<i64: 2, 2>}, {transform_indices = @transform_2, window_bounds = array<i64: 2>}, {transform_indices = @transform_3, window_bounds = array<i64: 1, 2, 512>}]} {
    %c0 = arith.constant 0 : index
    %c0_0 = arith.constant 0 : index
    %c0_1 = arith.constant 0 : index
    %0 = vector.load %arg2[%c0, %c0_0, %c0_1] : memref<1x2x512xf32, #tpu.memory_space<vmem>>, vector<1x1x512xf32>
    %1 = vector.shape_cast %0 : vector<1x1x512xf32> to vector<1x512xf32>
    %c0_2 = arith.constant 0 : index
    %c1 = arith.constant 1 : index
    %c0_3 = arith.constant 0 : index
    %2 = vector.load %arg2[%c0_2, %c1, %c0_3] : memref<1x2x512xf32, #tpu.memory_space<vmem>>, vector<1x1x512xf32>
    %3 = vector.shape_cast %2 : vector<1x1x512xf32> to vector<1x512xf32>
    %c0_4 = arith.constant 0 : index
    %c0_5 = arith.constant 0 : index
    %4 = memref.load %arg3[%c0_4, %c0_5] : memref<2x2xf32, #tpu.memory_space<smem>>
    %5 = vector.broadcast %4 : f32 to vector<1x512xf32>
    %6 = arith.mulf %1, %5 : vector<1x512xf32>
    %c0_6 = arith.constant 0 : index
    %c1_7 = arith.constant 1 : index
    %7 = memref.load %arg3[%c0_6, %c1_7] : memref<2x2xf32, #tpu.memory_space<smem>>
    %8 = vector.broadcast %7 : f32 to vector<1x512xf32>
    %9 = arith.mulf %3, %8 : vector<1x512xf32>
    %10 = arith.addf %6, %9 : vector<1x512xf32>
    %c0_8 = arith.constant 0 : index
    %11 = memref.load %arg4[%c0_8] : memref<2xf32, #tpu.memory_space<smem>>
    %12 = vector.broadcast %11 : f32 to vector<1x512xf32>
    %13 = arith.addf %10, %12 : vector<1x512xf32>
    %cst = arith.constant 0.000000e+00 : f32
    %14 = vector.broadcast %cst : f32 to vector<1x512xf32>
    %15 = arith.maximumf %13, %14 : vector<1x512xf32>
    %c1_9 = arith.constant 1 : index
    %c0_10 = arith.constant 0 : index
    %16 = memref.load %arg3[%c1_9, %c0_10] : memref<2x2xf32, #tpu.memory_space<smem>>
    %17 = vector.broadcast %16 : f32 to vector<1x512xf32>
    %18 = arith.mulf %1, %17 : vector<1x512xf32>
    %c1_11 = arith.constant 1 : index
    %c1_12 = arith.constant 1 : index
    %19 = memref.load %arg3[%c1_11, %c1_12] : memref<2x2xf32, #tpu.memory_space<smem>>
    %20 = vector.broadcast %19 : f32 to vector<1x512xf32>
    %21 = arith.mulf %3, %20 : vector<1x512xf32>
    %22 = arith.addf %18, %21 : vector<1x512xf32>
    %c1_13 = arith.constant 1 : index
    %23 = memref.load %arg4[%c1_13] : memref<2xf32, #tpu.memory_space<smem>>
    %24 = vector.broadcast %23 : f32 to vector<1x512xf32>
    %25 = arith.addf %22, %24 : vector<1x512xf32>
    %cst_14 = arith.constant 0.000000e+00 : f32
    %26 = vector.broadcast %cst_14 : f32 to vector<1x512xf32>
    %27 = arith.maximumf %25, %26 : vector<1x512xf32>
    %28 = arith.maximumf %15, %27 : vector<1x512xf32>
    %29 = arith.subf %15, %28 : vector<1x512xf32>
    %30 = math.exp %29 : vector<1x512xf32>
    %31 = arith.subf %27, %28 : vector<1x512xf32>
    %32 = math.exp %31 : vector<1x512xf32>
    %33 = arith.addf %30, %32 : vector<1x512xf32>
    %34 = tpu.reciprocal %33 {approx = true} : vector<1x512xf32> -> vector<1x512xf32>
    %35 = arith.mulf %30, %34 : vector<1x512xf32>
    %36 = math.tanh %35 : vector<1x512xf32>
    %37 = arith.mulf %32, %34 : vector<1x512xf32>
    %38 = math.tanh %37 : vector<1x512xf32>
    %39 = tpu.concatenate %36, %38 in 0 : vector<1x512xf32>, vector<1x512xf32> -> vector<2x512xf32>
    %c0_15 = arith.constant 0 : index
    %c0_16 = arith.constant 0 : index
    %c0_17 = arith.constant 0 : index
    %40 = vector.load %arg5[%c0_15, %c0_16, %c0_17] : memref<1x2x512xf32, #tpu.memory_space<vmem>>, vector<1x2x512xf32>
    %41 = vector.shape_cast %40 : vector<1x2x512xf32> to vector<2x512xf32>
    %42 = vector.shape_cast %39 : vector<2x512xf32> to vector<1x2x512xf32>
    tpu.vector_store %arg5[%c0_15, %c0_16, %c0_17], %42 {strides = array<i32>} : memref<1x2x512xf32, #tpu.memory_space<vmem>>, vector<1x2x512xf32>,
    return
  }
  func.func @transform_0(%arg0: i32, %arg1: i32) -> (i32, i32, i32) {
    %c0_i32 = arith.constant 0 : i32
    %c0_i32_0 = arith.constant 0 : i32
    return %arg0, %c0_i32, %arg1 : i32, i32, i32
  }
  func.func @transform_1(%arg0: i32, %arg1: i32) -> (i32, i32) {
    %c0_i32 = arith.constant 0 : i32
    %c0_i32_0 = arith.constant 0 : i32
    %c0_i32_1 = arith.constant 0 : i32
    return %c0_i32, %c0_i32_0 : i32, i32
  }
  func.func @transform_2(%arg0: i32, %arg1: i32) -> i32 {
    %c0_i32 = arith.constant 0 : i32
    %c0_i32_0 = arith.constant 0 : i32
    return %c0_i32 : i32
  }
  func.func @transform_3(%arg0: i32, %arg1: i32) -> (i32, i32, i32) {
    %c0_i32 = arith.constant 0 : i32
    %c0_i32_0 = arith.constant 0 : i32
    return %arg0, %c0_i32, %arg1 : i32, i32, i32
  }
}

</mosaic_0001>

<bundles_post_ra>
// kernel: tpu_custom_call.1
= control target key start
LH: loop header
LB: loop body
LE: loop exit
PB: predicated region body
PF: predicated region fallthrough
CT: control target
= control target key end

     0   :  { %s955_s0 = inlined_call_operand.hbm [shape: f32[2,2,1024], index: 0, kind: input, shape index: {}]   ;;  %s956_s1 = inlined_call_operand.hbm [shape: f32[2,2], index: 1, kind: input, shape index: {}]   ;;  %s957_s2 = inlined_call_operand.vmem [shape: f32[2], index: 2, kind: input, shape index: {}]   ;;  %s958_s3 = inlined_call_operand.hbm [shape: f32[2,2,1024], index: 3, kind: output, shape index: {}]  }
   0x1   :  { %964 = sst [smem:[#allocation18_spill]] %s956_s1 }
   0x2   :  { %965 = sst [smem:[#allocation19_spill]] %s957_s2 }
   0x3   :  { %8 = vsyncpa [#allocation3], 0 }
   0x4   :  { %10 = vsyncpa [#allocation3 + $0x1], 0 }
   0x5   :  { %11 = vsyncpa [#allocation5], 0 }
   0x6   :  { %12 = vsyncpa [#allocation6], 0 }
   0x7   :  { %13 = vsyncpa [#allocation4], 0 }
   0x8   :  { %15 = vsyncpa [#allocation4 + $0x1], 0  ;;  %s767_s12 = smov 0   ;;  %s769_s13 = smov 0  }
   0x9   :  { %s771_s14 = smov 0   ;;  %s773_s15 = smov 0  }
   0xa   :  { %s775_s16 = smov 0   ;;  %s777_s17 = smov 0  }
   0xb   :  { %s779_s18 = smov 0   ;;  %s781_s19 = smov 0  }
   0xc LB: > { %966 = sst [smem:[#allocation14_spill]] %s715_s12  ;;  %s442_s20 = sadd.s32 4294967295, %s743_s19   ;;  %s743_s19 = sphi %s781_s19, %s21_s19   ;;  %s739_s18 = sphi %s779_s18, %s989_s18   ;;  %s735_s17 = sphi %s777_s17, %s988_s17   ;;  %s731_s16 = sphi %s775_s16, %s987_s16   ;;  %s727_s15 = sphi %s773_s15, %s986_s15   ;;  %s723_s14 = sphi %s771_s14, %s985_s14   ;;  %s719_s13 = sphi %s769_s13, %s984_s13   ;;  %s715_s12 = sphi %s767_s12, %s983_s12  }
   0xd   : > { %s443_s21 = sadd.s32 4294967294, %s743_s19   ;;  %p55_p0 = scmp.ne.s32.totalorder %s719_s13, %s715_s12 }
   0xe   : > { %p811_p1 = scmp.eq.s32.totalorder %s442_s20, 0  ;;  %p815_p2 = scmp.eq.s32.totalorder %s442_s20, 3 }
   0xf   : > { %p129_p3 = scmp.eq.s32.totalorder %s443_s21, 3  ;;  %p444_p5 = scmp.ge.s32.totalorder %s743_s19, 1 }
  0x10   : > { %p821_p4 = por %p811_p1, %p55_p0  ;;  %p136_p7 = scmp.lt.s32.totalorder %s743_s19, 5 }
  0x11   : > { %p826_p6 = por %p129_p3, %p55_p0  ;;  %s972_s1 = sld [smem:[#allocation18_spill]] }
  0x12   : > { %p834_p8 = pnand %p444_p5, %p136_p7  ;;  %s974_s2 = sld [smem:[#allocation19_spill]] }
  0x13   : > { %s970_s25 = scalar_select %p826_p6, 1, 0 }
  0x14   : > { %p480_p9 = pneg %p834_p8  ;;  %s745_s6 = smov [#allocation7]  }
  0x15   : > { %971 = sst [smem:[#allocation15_spill]] %s970_s25  ;;  %s746_s7 = smov [#allocation8]  }
  0x16   : > { %p481_p10 = pnand %p480_p9, %p811_p1  ;;  %s30_s8 = sadd.s32 1, %s735_s17 }
  0x17   : > { %s148_s28 = sshll.u32 %s972_s1, 4  ;;  %s33_s9 = sadd.s32 1, %s739_s18  ;;  %s149_s28 = int_to_ptr.hbm [resolvable:$true] %s148_s28 }
  0x18   : > { %s158_s5 = sshll.u32 %s974_s2, 4  ;;  %p31_p11 = scmp.ge.s32.totalorder %s30_s8, 2  ;;  %s159_s5 = int_to_ptr.vmem [resolvable:$true] %s158_s5 }
  0x19   : > { %483 = dma.hbm_to_smem (!%p481_p10), %s149_s28, 32, %s745_s6, [#allocation5]  }
  0x1a   : > { %486 = dma.vmem_to_smem (!%p481_p10), %s159_s5, 16, %s746_s7, [#allocation6]  }
  0x1b   : > { %s42_s10 = sadd.s32 1, %s723_s14  ;;  %p49_p12 = scmp.ne.s32.totalorder %s723_s14, %s719_s13 }
  0x1c   : > { %p50_p13 = scmp.eq.s32.totalorder %s743_s19, 0  ;;  %s991_s8 = smov (%p31_p11, %s30_s8), 0 }
  0x1d   : > { %975 = sst [smem:[#allocation16_spill]] %s991_s8  ;;  %s993_s9 = smov (!%p31_p11, %s33_s9), %s739_s18 }
  0x1e   : > { %s38_s11 = ssub.s32 %s735_s17, %s991_s8  ;;  %p856_p0 = por %p50_p13, %p49_p12 }
  0x1f   : > { %p35_p3 = scmp.ge.s32.totalorder %s993_s9, 2  ;;  %p862_p5 = por %p815_p2, %p49_p12 }
  0x20   : > { %p497_p7 = scmp.lt.s32.totalorder %s743_s19, 4  ;;  %s169_s26 = sand.u32 1, %s723_s14  }
  0x21   : > { %s977_s21 = scalar_select %p862_p5, 1, 0 }
  0x22   : > { %s995_s9 = smov (%p35_p3, %s993_s9), 0  ;;  %s448_s27 = sshll.u32 %s169_s26, 3 }
  0x23   : > { %978 = sst [smem:[#allocation17_spill]] %s977_s21  ;;  %s37_s28 = ssub.s32 %s739_s18, %s995_s9 }
  0x24   : > { %s39_s30 = sor.u32 %s38_s11, %s37_s28  ;;  %s449_s4 = sshll.u32 %s735_s17, 2 }
  0x25   : > { %p40_p9 = scmp.eq.s32.totalorder %s39_s30, 0  ;;  %s450_s5 = sshll.u32 %s739_s18, 3 }
  0x26   : > { %s178_s6 = sadd.s32 %s450_s5, %s449_s4  ;;  %s173_s7 = scalar_lea.vmem [#allocation2], %s448_s27 }
  0x27   : > { %s184_s23 = sshll.u32 %s173_s7, 4  ;;  %s451_s2 = sshll.u32 %s178_s6, 1  ;;  %s185_s23 = int_to_ptr.vmem [resolvable:$true] %s184_s23 }
  0x28   : > { %s875_s1 = scalar_select %p40_p9, %s723_s14, %s42_s10  }
  0x29   : > { %s180_s12 = scalar_lea.hbm %s955_s0, %s451_s2  ;;  %p488_p2 = pnand %p497_p7, %p856_p0 }
  0x2a   : > { %s182_s21 = sshll.u32 %s180_s12, 4  ;;  %s170_s11 = scalar_lea.sflag [#allocation3], %s169_s26  ;;  %s183_s21 = int_to_ptr.hbm [resolvable:$true] %s182_s21 }
  0x2b   : > { %490 = dma.hbm_to_vmem [thread:$0]  (!%p488_p2), %s183_s21, 128, %s185_s23, %s170_s11  }
  0x2c   : > { %193 = sbr.rel (%p834_p8) target bundleno = 118 (0x76), region = 32  ;;  %s887_s10 = sand.u32 (!%p834_p8), 1, %s719_s13  }
  0x2d   : > { %s453_s27 = sshll.u32 (!%p834_p8), %s887_s10, 3  ;;  %s196_s25 = scalar_lea.sflag (!%p834_p8), [#allocation3], %s887_s10 }
  0x2e   : > { %s199_s2 = scalar_lea.vmem (!%p834_p8), [#allocation2], %s453_s27 }
  0x31   : > { %698 = dma.done.wait (%p821_p4), %s196_s25, 128  }
  0x32   : > { %700 = vsyncadd (%p821_p4), %s196_s25, 4294967168 }
  0x33   : > { %702 = dma.done.wait (%p811_p1), [#allocation5], 32  }
  0x34   : > { %704 = vsyncadd (%p811_p1), [#allocation5], 4294967264 }
  0x35   : > { %706 = dma.done.wait (%p811_p1), [#allocation6], 16  }
  0x36   : > { %708 = vsyncadd (%p811_p1), [#allocation6], 4294967280 }
  0x37   : > { %215 = sfence }
  0x38   : > { %s239_s12 = sld [smem:[#allocation7]]  ;;  %v236_v0 = vld [vmem:[%s199_s2] ss:$2 sm:$0xf]  ;;  %s463_s22 = sshll.u32 %s727_s15, 2  ;;  %vm292_vm0 = vcmask 1040384  }
  0x39   : > { %s458_s29 = sld [smem:[#allocation7 + $0x1]]  ;;  %v457_v1 = vld [vmem:[%s199_s2 + $0x1] ss:$2 sm:$0xf]  ;;  %s464_s26 = sshll.u32 %s731_s16, 3  ;;  %vm304_vm1 = vcmask 1041408  }
  0x3a   : > { %s246_s8 = sld [smem:[#allocation8]]  ;;  %s324_s28 = sadd.s32 %s464_s26, %s463_s22  ;;  %vm306_vm2 = vcmask 1045508   ;;  %vm308_vm3 = vcmask 1043456  }
  0x3b   : > { %s459_s20 = sld [smem:[#allocation7 + $0x80]]  ;;  %s465_s30 = sshll.u32 %s324_s28, 1 }
  0x3c   : > { %s460_s24 = sld [smem:[#allocation7 + $0x81]]  ;;  %s326_s6 = scalar_lea.hbm %s958_s3, %s465_s30 }
  0x3d   : > { %s461_s21 = sld [smem:[#allocation8 + $0x1]]  ;;  %s233_s15 = scalar_lea.vmem [#allocation9], %s453_s27 }
  0x3e   : > { %v240_v2 = vstv %s239_s12  ;;  %s328_s16 = sshll.u32 %s233_s15, 4  ;;  %s330_s7 = sshll.u32 %s326_s6, 4  ;;  %s329_s16 = int_to_ptr.vmem [resolvable:$true] %s328_s16  ;;  %s331_s7 = int_to_ptr.hbm [resolvable:$true] %s330_s7 }
  0x3f   : > { %v241_v3 = vmul.f32 %v240_v2, %v236_v0  ;;  %v243_v4 = vstv %s458_s29  ;;  %s313_s11 = scalar_lea.sflag [#allocation4], %s887_s10  ;;  %s651_s27 = sshra.s32 %s331_s7, 4  ;;  %s652_s27 = int_to_ptr.hbm [resolvable:$true] %s651_s27 }
  0x40   : > { %v244_v5 = vmul.f32 %v457_v1, %v243_v4  ;;  %v247_v6 = vstv %s246_s8  ;;  %s653_s25 = scalar_lea.hbm %s652_s27, 8  ;;  %s657_s29 = scalar_lea.hbm %s958_s3, 32 }
  0x41   : > { %v251_v7 = vstv %s459_s20  ;;  %p654_p1 = scmp.ne.s32.totalorder %s652_s27, %s653_s25  ;;  %p658_p10 = scmp.lt.s32.totalorder %s652_s27, %s958_s3 }
  0x42   : > { %v245_v8 = vadd.f32 %v244_v5, %v241_v3  ;;  %v252_v9 = vmul.f32 %v251_v7, %v236_v0  ;;  %v254_v10 = vstv %s460_s24  ;;  %p659_p11 = scmp.lt.s32.totalorder %s657_s29, %s653_s25 }
  0x43   : > { %v255_v11 = vmul.f32 %v457_v1, %v254_v10  ;;  %v258_v13 = vstv %s461_s21  ;;  %p655_p4 = pnand %p654_p1, %p862_p5 }
  0x44   : > { %v248_v12 = vadd.f32 %v247_v6, %v245_v8  ;;  %p660_p12 = por %p659_p11, %p658_p10 }
  0x45   : > { %v256_v14 = vadd.f32 %v255_v11, %v252_v9  ;;  %p656_p8 = pneg %p655_p4 }
  0x46   : > { %v249_v15 = vmax.f32 %v248_v12, 0.0 }
  0x47   : > { %v259_v16 = vadd.f32 %v258_v13, %v256_v14  ;;  %p661_p13 = pnand %p660_p12, %p656_p8 }
  0x49   : > { %v260_v17 = vmax.f32 %v259_v16, 0.0 }
  0x4b   : > { %v261_v18 = vmax.f32 %v249_v15, %v260_v17 }
  0x4d   : > { %v262_v19 = vsub.f32 %v249_v15, %v261_v18  ;;  %v265_v20 = vsub.f32 %v260_v17, %v261_v18 }
  0x4f   : > { %v263_v21 = vmul.f32 1.442695, %v262_v19  ;;  %v266_v22 = vmul.f32 1.442695, %v265_v20 }
  0x51   : > { %567 = vpow2.f32 %v263_v21 }
  0x52   : > { %569 = vpow2.f32 %v266_v22 }
  0x57   : > { %v568_v23 = vpop.eup %567 }
  0x58   : > { %v570_v24 = vpop.eup %569 }
  0x59   : > { %v268_v25 = vadd.f32 %v570_v24, %v568_v23 }
  0x5b   : > { %571 = vrcp.f32 %v268_v25 }
  0x61   : > { %v572_v26 = vpop.eup %571 }
  0x62   : > { %v270_v27 = vmul.f32 %v572_v26, %v568_v23  ;;  %v272_v28 = vmul.f32 %v572_v26, %v570_v24 }
  0x64   : > { %573 = vtanh.f32 %v270_v27 }
  0x65   : > { %575 = vtanh.f32 %v272_v28 }
  0x6a   : > { %v574_v29 = vpop.eup %573 }
  0x6b   : > { %v576_v30 = vpop.eup %575  ;;  %v275_v31 = vperm.slane %v574_v29, 0  ;;  %v276_v32 = vperm.slane %v574_v29, 1  ;;  %v277_v33 = vperm.slane %v574_v29, 2  ;;  %v278_v34 = vperm.slane %v574_v29, 3 }
  0x6c   : > { %v284_v35 = vperm.slane %v576_v30, 0  ;;  %v285_v36 = vperm.slane %v576_v30, 1  ;;  %v286_v37 = vperm.slane %v576_v30, 2  ;;  %v287_v38 = vperm.slane %v576_v30, 3 }
  0x6e   : > { %v293_v39 = vsel %vm292_vm0, %v275_v31, %v284_v35  ;;  %v294_v40 = vsel %vm292_vm0, %v276_v32, %v285_v36  ;;  %v295_v41 = vsel %vm292_vm0, %v277_v33, %v286_v37  ;;  %v296_v42 = vsel %vm292_vm0, %v278_v34, %v287_v38 }
  0x6f   : > { %v301_v43 = vrot.slane %v294_v40, 6  ;;  %v302_v44 = vrot.slane %v295_v41, 4  ;;  %v303_v45 = vrot.slane %v296_v42, 2 }
  0x71   : > { %v305_v46 = vsel %vm304_vm1, %v293_v39, %v301_v43  ;;  %v307_v47 = vsel %vm306_vm2, %v302_v44, %v303_v45 }
  0x72   : > { %v309_v48 = vsel %vm308_vm3, %v305_v46, %v307_v47 }
  0x73   : > { %311 = vst [vmem:[%s233_s15] sm:$0xff] %v309_v48 }
  0x74   : > { %664 = shalt.err (!%p661_p13)
}
  0x75   : > { %478 = dma.vmem_to_hbm [thread:$0]  (%p862_p5), %s329_s16, 128, %s331_s7, %s313_s11  }
  0x76 PF: > { %s980_s10 = sld [smem:[#allocation14_spill]]  ;;  %p500_p0 = scmp.ge.s32.totalorder %s743_s19, 2 }
  0x78   : > { %p492_p3 = pnand %p500_p0, %p826_p6 }
  0x7a   : > { %p493_p7 = pneg %p492_p3 }
  0x7c   : > { %s342_s21 = sand.u32 1, %s980_s10  }
  0x7d   : > { %s343_s22 = scalar_lea.sflag [#allocation4], %s342_s21 }
  0x7e   : > { %710 = dma.done.wait (%p493_p7), %s343_s22, 128  }
  0x7f   : > { %712 = vsyncadd (%p493_p7), %s343_s22, 4294967168  ;;  %s21_s19 = sadd.s32 1, %s743_s19   ;;  %s982_s26 = sld [smem:[#allocation16_spill]] }
  0x80   : > { %p18_p9 = scmp.ge.s32.totalorder %s21_s19, 6   ;;  %s983_s12 = smov %s719_s13 }
  0x81   : > { %s984_s13 = smov %s723_s14  ;;  %s985_s14 = smov %s875_s1 }
  0x82   : > { %s986_s15 = smov %s735_s17  ;;  %s987_s16 = smov %s739_s18 }
  0x83   : > { %s989_s18 = smov %s995_s9  ;;  %20 = sbr.rel (!%p18_p9) target bundleno = 12 (0xc), region = 88 }
  0x85   : > { %s988_s17 = smov %s982_s26 }
  0x88   :  { %349 = vsyncpa [#allocation3], 1 }
  0x89   :  { %351 = vsyncpa [#allocation3 + $0x1], 1 }
  0x8a   :  { %352 = vsyncpa [#allocation4], 1 }
  0x8b   :  { %354 = vsyncpa [#allocation4 + $0x1], 1 }
  0x8c   :  { %355 = vsyncpa [#allocation5], 1 }
  0x8d   :  { %357 = vsyncpa [#allocation5 + $0x1], 1 }
  0x8e   :  { %358 = vsyncpa [#allocation6], 1 }
  0x8f   :  { %360 = vsyncpa [#allocation6 + $0x1], 1 }

</bundles_post_ra>
